<compile_context>
chip_gen: v6e
topology: v6e:2x2x1
jax: 0.10.0
libtpu: 0.0.40
codegen_flags: <defaults>
</compile_context>

<pallas_src>
import jax
import jax.numpy as jnp
from jax.experimental import pallas as pl
from jax.experimental.pallas import tpu as pltpu

INPUT_DIM = 64        # latent / noise dim (z)
HIDDEN_DIM = 256      # matches module's hidden_dim
OUTPUT_DIM = 784      # matches module's output_dim (28*28)
OUTPUT_DIM_PAD = 896  # 7 * 128 -> lane-dense output stores


def _round_up(x, m):
    return ((x + m - 1) // m) * m


def generator_kernel(z_ref, w1_ref, b1_ref, w2_ref, b2_ref, w3_ref, b3_ref, o_ref):
    # Layer 1: Linear + ReLU  (bf16 MXU inputs, f32 accumulation / elementwise)
    z = z_ref[...].astype(jnp.bfloat16)
    h1 = jnp.dot(z, w1_ref[...], preferred_element_type=jnp.float32)
    h1 = jnp.maximum(h1 + b1_ref[...], 0.0)
    # Layer 2: Linear + ReLU
    h2 = jnp.dot(h1.astype(jnp.bfloat16), w2_ref[...],
                 preferred_element_type=jnp.float32)
    h2 = jnp.maximum(h2 + b2_ref[...], 0.0)
    # Layer 3: Linear + Tanh (padded output width; extra cols have zero W/b)
    h3 = jnp.dot(h2.astype(jnp.bfloat16), w3_ref[...],
                 preferred_element_type=jnp.float32)
    o_ref[...] = jnp.tanh(h3 + b3_ref[...]).astype(o_ref.dtype)


def generator_forward(z, w1, b1, w2, b2, w3, b3, *, tm=512):
    """z: [B, INPUT_DIM] float32.

    Weights: bf16, [in, out]; w3/b3 padded to OUTPUT_DIM_PAD with zeros.
    Biases: f32, [1, out].
    Returns: [B, OUTPUT_DIM] bf16 (tanh output).
    """
    B = z.shape[0]
    TM = min(tm, _round_up(B, 8))          # batch tile (sublane-aligned)
    Bp = _round_up(B, TM)                  # padded batch
    if Bp != B:
        z = jnp.pad(z, ((0, Bp - B), (0, 0)))
    grid = (Bp // TM,)

    flops = 2 * Bp * (INPUT_DIM * HIDDEN_DIM
                      + HIDDEN_DIM * HIDDEN_DIM
                      + HIDDEN_DIM * OUTPUT_DIM_PAD)
    bytes_accessed = int(
        Bp * INPUT_DIM * 4                                   # z (f32)
        + Bp * OUTPUT_DIM_PAD * 2                            # output (bf16)
        + sum(int(a.size) * a.dtype.itemsize for a in (w1, b1, w2, b2, w3, b3))
    )

    out = pl.pallas_call(
        generator_kernel,
        out_shape=jax.ShapeDtypeStruct((Bp, OUTPUT_DIM_PAD), jnp.bfloat16),
        grid=grid,
        in_specs=[
            pl.BlockSpec((TM, INPUT_DIM), lambda i: (i, 0)),               # z tile
            pl.BlockSpec((INPUT_DIM, HIDDEN_DIM), lambda i: (0, 0)),       # w1 (resident)
            pl.BlockSpec((1, HIDDEN_DIM), lambda i: (0, 0)),               # b1
            pl.BlockSpec((HIDDEN_DIM, HIDDEN_DIM), lambda i: (0, 0)),      # w2
            pl.BlockSpec((1, HIDDEN_DIM), lambda i: (0, 0)),               # b2
            pl.BlockSpec((HIDDEN_DIM, OUTPUT_DIM_PAD), lambda i: (0, 0)),  # w3
            pl.BlockSpec((1, OUTPUT_DIM_PAD), lambda i: (0, 0)),           # b3
        ],
        out_specs=pl.BlockSpec((TM, OUTPUT_DIM_PAD), lambda i: (i, 0)),
        compiler_params=pltpu.CompilerParams(
            dimension_semantics=("parallel",)),
        cost_estimate=pl.CostEstimate(
            flops=flops,
            transcendentals=Bp * OUTPUT_DIM_PAD,
            bytes_accessed=bytes_accessed),
    )(z, w1, b1, w2, b2, w3, b3)

    return out[:B, :OUTPUT_DIM]


def init_params(key):
    """Deterministic init mimicking PyTorch Linear default (uniform +-1/sqrt(fan_in)).

    Weights returned as bf16 [in, out]; biases f32 [1, out]; layer-3 padded to
    OUTPUT_DIM_PAD with zero columns.
    """
    ks = jax.random.split(key, 6)

    def linear(kw, kb, fan_in, fan_out, pad_to=None):
        bound = 1.0 / jnp.sqrt(fan_in)
        w = jax.random.uniform(kw, (fan_in, fan_out), jnp.float32, -bound, bound)
        b = jax.random.uniform(kb, (1, fan_out), jnp.float32, -bound, bound)
        if pad_to is not None and pad_to > fan_out:
            w = jnp.pad(w, ((0, 0), (0, pad_to - fan_out)))
            b = jnp.pad(b, ((0, 0), (0, pad_to - fan_out)))
        return w.astype(jnp.bfloat16), b

    w1, b1 = linear(ks[0], ks[1], INPUT_DIM, HIDDEN_DIM)
    w2, b2 = linear(ks[2], ks[3], HIDDEN_DIM, HIDDEN_DIM)
    w3, b3 = linear(ks[4], ks[5], HIDDEN_DIM, OUTPUT_DIM, pad_to=OUTPUT_DIM_PAD)
    return w1, b1, w2, b2, w3, b3


def _reference(z, params):
    """Plain-JAX reference using the same bf16-quantized weights/activations."""
    w1, b1, w2, b2, w3, b3 = params
    w1f, w2f, w3f = (w.astype(jnp.float32) for w in (w1, w2, w3))
    zf = z.astype(jnp.bfloat16).astype(jnp.float32)
    h1 = jnp.maximum(zf @ w1f + b1, 0.0)
    h2 = jnp.maximum(h1.astype(jnp.bfloat16).astype(jnp.float32) @ w2f + b2, 0.0)
    out = jnp.tanh(h2.astype(jnp.bfloat16).astype(jnp.float32) @ w3f + b3)
    return out[:, :OUTPUT_DIM]


if __name__ == "__main__":
    key = jax.random.PRNGKey(0)
    k_params, k_z, k_z2 = jax.random.split(key, 3)

    params = init_params(k_params)

    # Primary small-shape run: batch=8 latent vectors of dim 64.
    batch = 8
    z = jax.random.normal(k_z, (batch, INPUT_DIM), dtype=jnp.float32)
    out = generator_forward(z, *params)
    out = jax.block_until_ready(out)
    assert out.shape == (batch, OUTPUT_DIM)
    ref = _reference(z, params)
    assert jnp.allclose(out.astype(jnp.float32), ref, atol=2e-2, rtol=2e-2)

    # Secondary check exercising the batch grid + ragged-batch padding path
    # (20 rows, tile of 8 -> 3 grid steps with 4 padded rows).
    z2 = jax.random.normal(k_z2, (20, INPUT_DIM), dtype=jnp.float32)
    out2 = jax.block_until_ready(generator_forward(z2, *params, tm=8))
    ref2 = _reference(z2, params)
    assert out2.shape == (20, OUTPUT_DIM)
    assert jnp.allclose(out2.astype(jnp.float32), ref2, atol=2e-2, rtol=2e-2)

    print("KERNEL_OK")
</pallas_src>

<mosaic_0001>
module attributes {stable_mosaic.version = 11 : i64} {
  func.func @generator_kernel(%arg0: i32, %arg1: memref<8x64xf32, #tpu.memory_space<vmem>>, %arg2: memref<64x256xbf16, #tpu.memory_space<vmem>>, %arg3: memref<1x256xf32, #tpu.memory_space<vmem>>, %arg4: memref<256x256xbf16, #tpu.memory_space<vmem>>, %arg5: memref<1x256xf32, #tpu.memory_space<vmem>>, %arg6: memref<256x896xbf16, #tpu.memory_space<vmem>>, %arg7: memref<1x896xf32, #tpu.memory_space<vmem>>, %arg8: memref<8x896xbf16, #tpu.memory_space<vmem>>) attributes {dimension_semantics = [#tpu.dimension_semantics<parallel>], iteration_bounds = array<i64: 1>, scalar_prefetch = 0 : i64, scratch_operands = 0 : i64, tpu.core_type = #tpu.core_type<tc>, window_params = [{transform_indices = @transform_0, window_bounds = array<i64: 8, 64>}, {pipeline_mode = #tpu.pipeline_mode<synchronous>, transform_indices = @transform_1, window_bounds = array<i64: 64, 256>}, {pipeline_mode = #tpu.pipeline_mode<synchronous>, transform_indices = @transform_2, window_bounds = array<i64: 1, 256>}, {pipeline_mode = #tpu.pipeline_mode<synchronous>, transform_indices = @transform_3, window_bounds = array<i64: 256, 256>}, {pipeline_mode = #tpu.pipeline_mode<synchronous>, transform_indices = @transform_4, window_bounds = array<i64: 1, 256>}, {pipeline_mode = #tpu.pipeline_mode<synchronous>, transform_indices = @transform_5, window_bounds = array<i64: 256, 896>}, {pipeline_mode = #tpu.pipeline_mode<synchronous>, transform_indices = @transform_6, window_bounds = array<i64: 1, 896>}, {transform_indices = @transform_7, window_bounds = array<i64: 8, 896>}]} {
    %c0 = arith.constant 0 : index
    %c0_0 = arith.constant 0 : index
    %0 = vector.load %arg1[%c0, %c0_0] : memref<8x64xf32, #tpu.memory_space<vmem>>, vector<8x64xf32>
    %1 = arith.truncf %0 : vector<8x64xf32> to vector<8x64xbf16>
    %c0_1 = arith.constant 0 : index
    %c0_2 = arith.constant 0 : index
    %2 = vector.load %arg2[%c0_1, %c0_2] : memref<64x256xbf16, #tpu.memory_space<vmem>>, vector<64x256xbf16>
    %cst = arith.constant dense<0.000000e+00> : vector<8x256xf32>
    %3 = tpu.matmul %1, %2, %cst {dimension_numbers = #tpu.dot_dimension_numbers<[1], [0], [0], [1], [0, 0, 1, 1], [], []>} : vector<8x64xbf16>, vector<64x256xbf16>, vector<8x256xf32> -> vector<8x256xf32>
    %c0_3 = arith.constant 0 : index
    %c0_4 = arith.constant 0 : index
    %4 = vector.load %arg3[%c0_3, %c0_4] : memref<1x256xf32, #tpu.memory_space<vmem>>, vector<1x256xf32>
    %5 = vector.broadcast %4 : vector<1x256xf32> to vector<8x256xf32>
    %6 = arith.addf %3, %5 : vector<8x256xf32>
    %cst_5 = arith.constant 0.000000e+00 : f32
    %7 = vector.broadcast %cst_5 : f32 to vector<8x256xf32>
    %8 = arith.maximumf %6, %7 : vector<8x256xf32>
    %9 = arith.truncf %8 : vector<8x256xf32> to vector<8x256xbf16>
    %c0_6 = arith.constant 0 : index
    %c0_7 = arith.constant 0 : index
    %10 = vector.load %arg4[%c0_6, %c0_7] : memref<256x256xbf16, #tpu.memory_space<vmem>>, vector<256x256xbf16>
    %cst_8 = arith.constant dense<0.000000e+00> : vector<8x256xf32>
    %11 = tpu.matmul %9, %10, %cst_8 {dimension_numbers = #tpu.dot_dimension_numbers<[1], [0], [0], [1], [0, 0, 1, 1], [], []>} : vector<8x256xbf16>, vector<256x256xbf16>, vector<8x256xf32> -> vector<8x256xf32>
    %c0_9 = arith.constant 0 : index
    %c0_10 = arith.constant 0 : index
    %12 = vector.load %arg5[%c0_9, %c0_10] : memref<1x256xf32, #tpu.memory_space<vmem>>, vector<1x256xf32>
    %13 = vector.broadcast %12 : vector<1x256xf32> to vector<8x256xf32>
    %14 = arith.addf %11, %13 : vector<8x256xf32>
    %cst_11 = arith.constant 0.000000e+00 : f32
    %15 = vector.broadcast %cst_11 : f32 to vector<8x256xf32>
    %16 = arith.maximumf %14, %15 : vector<8x256xf32>
    %17 = arith.truncf %16 : vector<8x256xf32> to vector<8x256xbf16>
    %c0_12 = arith.constant 0 : index
    %c0_13 = arith.constant 0 : index
    %18 = vector.load %arg6[%c0_12, %c0_13] : memref<256x896xbf16, #tpu.memory_space<vmem>>, vector<256x896xbf16>
    %cst_14 = arith.constant dense<0.000000e+00> : vector<8x896xf32>
    %19 = tpu.matmul %17, %18, %cst_14 {dimension_numbers = #tpu.dot_dimension_numbers<[1], [0], [0], [1], [0, 0, 1, 1], [], []>} : vector<8x256xbf16>, vector<256x896xbf16>, vector<8x896xf32> -> vector<8x896xf32>
    %c0_15 = arith.constant 0 : index
    %c0_16 = arith.constant 0 : index
    %20 = vector.load %arg7[%c0_15, %c0_16] : memref<1x896xf32, #tpu.memory_space<vmem>>, vector<1x896xf32>
    %21 = vector.broadcast %20 : vector<1x896xf32> to vector<8x896xf32>
    %22 = arith.addf %19, %21 : vector<8x896xf32>
    %23 = math.tanh %22 : vector<8x896xf32>
    %24 = arith.truncf %23 : vector<8x896xf32> to vector<8x896xbf16>
    %c0_17 = arith.constant 0 : index
    %c0_18 = arith.constant 0 : index
    %25 = vector.load %arg8[%c0_17, %c0_18] : memref<8x896xbf16, #tpu.memory_space<vmem>>, vector<8x896xbf16>
    tpu.vector_store %arg8[%c0_17, %c0_18], %24 {strides = array<i32>} : memref<8x896xbf16, #tpu.memory_space<vmem>>, vector<8x896xbf16>,
    return
  }
  func.func @transform_0(%arg0: i32) -> (i32, i32) {
    %c0_i32 = arith.constant 0 : i32
    %c0_i32_0 = arith.constant 0 : i32
    return %arg0, %c0_i32 : i32, i32
  }
  func.func @transform_1(%arg0: i32) -> (i32, i32) {
    %c0_i32 = arith.constant 0 : i32
    %c0_i32_0 = arith.constant 0 : i32
    %c0_i32_1 = arith.constant 0 : i32
    return %c0_i32, %c0_i32_0 : i32, i32
  }
  func.func @transform_2(%arg0: i32) -> (i32, i32) {
    %c0_i32 = arith.constant 0 : i32
    %c0_i32_0 = arith.constant 0 : i32
    %c0_i32_1 = arith.constant 0 : i32
    return %c0_i32, %c0_i32_0 : i32, i32
  }
  func.func @transform_3(%arg0: i32) -> (i32, i32) {
    %c0_i32 = arith.constant 0 : i32
    %c0_i32_0 = arith.constant 0 : i32
    %c0_i32_1 = arith.constant 0 : i32
    return %c0_i32, %c0_i32_0 : i32, i32
  }
  func.func @transform_4(%arg0: i32) -> (i32, i32) {
    %c0_i32 = arith.constant 0 : i32
    %c0_i32_0 = arith.constant 0 : i32
    %c0_i32_1 = arith.constant 0 : i32
    return %c0_i32, %c0_i32_0 : i32, i32
  }
  func.func @transform_5(%arg0: i32) -> (i32, i32) {
    %c0_i32 = arith.constant 0 : i32
    %c0_i32_0 = arith.constant 0 : i32
    %c0_i32_1 = arith.constant 0 : i32
    return %c0_i32, %c0_i32_0 : i32, i32
  }
  func.func @transform_6(%arg0: i32) -> (i32, i32) {
    %c0_i32 = arith.constant 0 : i32
    %c0_i32_0 = arith.constant 0 : i32
    %c0_i32_1 = arith.constant 0 : i32
    return %c0_i32, %c0_i32_0 : i32, i32
  }
  func.func @transform_7(%arg0: i32) -> (i32, i32) {
    %c0_i32 = arith.constant 0 : i32
    %c0_i32_0 = arith.constant 0 : i32
    return %arg0, %c0_i32 : i32, i32
  }
}

</mosaic_0001>

<bundles_post_ra>
// kernel: tpu_custom_call.1
= control target key start
LH: loop header
LB: loop body
LE: loop exit
PB: predicated region body
PF: predicated region fallthrough
CT: control target
= control target key end

     0   :  { %12 = vsyncpa [#allocation3], 0  ;;  %s2075_s0 = inlined_call_operand.hbm [shape: f32[8,64], index: 0, kind: input, shape index: {}]   ;;  %s2076_s1 = inlined_call_operand.hbm [shape: bf16[64,256], index: 1, kind: input, shape index: {}]   ;;  %s2077_s2 = inlined_call_operand.vmem [shape: f32[1,256], index: 2, kind: input, shape index: {}]   ;;  %s2078_s3 = inlined_call_operand.hbm [shape: bf16[256,256], index: 3, kind: input, shape index: {}]   ;;  %s2079_s4 = inlined_call_operand.hbm [shape: f32[1,256], index: 4, kind: input, shape index: {}]   ;;  %s2080_s5 = inlined_call_operand.hbm [shape: bf16[256,896], index: 5, kind: input, shape index: {}]   ;;  %s2081_s6 = inlined_call_operand.vmem [shape: f32[1,896], index: 6, kind: input, shape index: {}]   ;;  %s2082_s7 = inlined_call_operand.hbm [shape: bf16[8,896], index: 7, kind: output, shape index: {}]  }
   0x1   :  { %13 = vsyncpa [#allocation6], 0 }
   0x2   :  { %14 = vsyncpa [#allocation9], 0 }
   0x3   :  { %15 = vsyncpa [#allocation4], 0  ;;  %s1969_s24 = smov [#allocation5]  }
   0x4   :  { %s31_s25 = sshll.u32 %s1969_s24, 4  ;;  %s32_s25 = int_to_ptr.vmem [resolvable:$true] %s31_s25 }
   0x5   :  { %s1849_s26 = scalar_lea.vmem %s32_s25, 1024  ;;  %p1854_p1 = scmp.lt.s32.totalorder %s32_s25, %s32_s25 }
   0x6   :  { %p1850_p0 = scmp.ne.s32.totalorder %s32_s25, %s1849_s26  ;;  %p1855_p2 = scmp.lt.s32.totalorder %s1849_s26, %s1849_s26 }
   0x8   :  { %p1856_p3 = por %p1855_p2, %p1854_p1 }
   0xa   :  { %p1857_p4 = pnand %p1856_p3, %p1850_p0 }
   0xc   :  { %1860 = shalt.err (!%p1857_p4)
}
   0xd   :  { %s1970_s27 = smov 128   ;;  %s1971_s28 = smov 8  }
   0xe   :  { %37 = dma.hbm_to_vmem [thread:$0]  %s2076_s1, 1024, %s32_s25, [#allocation6], %s1970_s27, %s1970_s27, %s1971_s28  }
   0xf   :  { %s1972_s8 = smov [#allocation8]   ;;  %s1973_s10 = smov [#allocation2]  }
  0x10   :  { %s58_s9 = sshll.u32 %s1972_s8, 4  ;;  %s22_s11 = sshll.u32 %s1973_s10, 4  ;;  %s59_s9 = int_to_ptr.vmem [resolvable:$true] %s58_s9  ;;  %s23_s11 = int_to_ptr.vmem [resolvable:$true] %s22_s11 }
  0x11   :  { %s1869_s12 = scalar_lea.vmem %s59_s9, 32  ;;  %p1874_p6 = scmp.lt.s32.totalorder %s59_s9, %s59_s9 }
  0x12   :  { %p1870_p5 = scmp.ne.s32.totalorder %s59_s9, %s1869_s12  ;;  %p1875_p7 = scmp.lt.s32.totalorder %s1869_s12, %s1869_s12 }
  0x14   :  { %p1876_p8 = por %p1875_p7, %p1874_p6 }
  0x16   :  { %p1877_p9 = pnand %p1876_p8, %p1870_p5 }
  0x18   :  { %1880 = shalt.err (!%p1877_p9)
}
  0x19   :  { %61 = dma.hbm_to_vmem [thread:$0]  %s2079_s4, 32, %s59_s9, [#allocation9]  }
  0x1a   :  { %s1889_s15 = scalar_lea.vmem %s23_s11, 128  ;;  %p1894_p11 = scmp.lt.s32.totalorder %s23_s11, %s23_s11 }
  0x1b   :  { %p1890_p10 = scmp.ne.s32.totalorder %s23_s11, %s1889_s15  ;;  %p1895_p12 = scmp.lt.s32.totalorder %s1889_s15, %s1889_s15 }
  0x1d   :  { %p1896_p13 = por %p1895_p12, %p1894_p11 }
  0x1f   :  { %p1897_p0 = pnand %p1896_p13, %p1890_p10 }
  0x21   :  { %1900 = shalt.err (!%p1897_p0)
}
  0x22   :  { %25 = dma.hbm_to_vmem [thread:$0]  %s2075_s0, 128, %s23_s11, [#allocation3]  }
  0x23   :  { %s1974_s17 = smov [#allocation7]   ;;  %s1975_s19 = smov [#allocation10]  }
  0x24   :  { %s45_s18 = sshll.u32 %s1974_s17, 4  ;;  %s67_s20 = sshll.u32 %s1975_s19, 4  ;;  %s46_s18 = int_to_ptr.vmem [resolvable:$true] %s45_s18  ;;  %s68_s20 = int_to_ptr.vmem [resolvable:$true] %s67_s20 }
  0x25   :  { %s1909_s21 = scalar_lea.vmem %s46_s18, 4096  ;;  %p1914_p2 = scmp.lt.s32.totalorder %s46_s18, %s46_s18 }
  0x26   :  { %p1910_p1 = scmp.ne.s32.totalorder %s46_s18, %s1909_s21  ;;  %p1915_p3 = scmp.lt.s32.totalorder %s1909_s21, %s1909_s21 }
  0x28   :  { %p1916_p4 = por %p1915_p3, %p1914_p2 }
  0x2a   :  { %p1917_p5 = pnand %p1916_p4, %p1910_p1 }
  0x2c   :  { %1920 = shalt.err (!%p1917_p5)
}
  0x2d   :  { %51 = dma.hbm_to_vmem [thread:$0]  %s2078_s3, 4096, %s46_s18, [#allocation6], %s1970_s27, %s1970_s27, %s1971_s28  }
  0x2e   :  { %s1929_s0 = scalar_lea.vmem %s68_s20, 14336  ;;  %p1934_p7 = scmp.lt.s32.totalorder %s68_s20, %s68_s20 }
  0x2f   :  { %p1930_p6 = scmp.ne.s32.totalorder %s68_s20, %s1929_s0  ;;  %p1935_p8 = scmp.lt.s32.totalorder %s1929_s0, %s1929_s0 }
  0x31   :  { %p1936_p9 = por %p1935_p8, %p1934_p7 }
  0x33   :  { %p1937_p10 = pnand %p1936_p9, %p1930_p6 }
  0x35   :  { %1940 = shalt.err (!%p1937_p10)
}
  0x36   :  { %s1976_s23 = smov 448   ;;  %s1977_s24 = smov 28  }
  0x37   :  { %73 = dma.hbm_to_vmem [thread:$0]  %s2080_s5, 14336, %s68_s20, [#allocation9], %s1976_s23, %s1976_s23, %s1977_s24  }
  0x38   :  { %1961 = dma.done.wait [#allocation3], 128  }
  0x39   :  { %1962 = vsyncadd [#allocation3], 4294967168 }
  0x3a   :  { %1963 = dma.done.wait [#allocation6], 5120  }
  0x3b   :  { %1964 = vsyncadd [#allocation6], 4294962176 }
  0x3c   :  { %1965 = dma.done.wait [#allocation9], 14368  }
  0x3d   :  { %1966 = vsyncadd [#allocation9], 4294952928  ;;  %v1978_v0 = vmov 0   ;;  %v1607_v1 = vld [vmem:[#allocation5 + $0x34] ss:$8 sps:$4 sm:$0xff]   ;;  %vm154_vm0 = vcmask 523264  }
  0x3e   :  { %190 = vmatprep.mubr.bf16.mxu0 %v1978_v0  ;;  %v1609_v2 = vld [vmem:[#allocation5 + $0x30] ss:$8 sps:$4 sm:$0xff]   ;;  %166 = vmatprep.subr.bf16.mxu0 %v1607_v1  ;;  %v1610_v3 = vld [vmem:[#allocation5 + $0x24] ss:$8 sps:$4 sm:$0xff]   ;;  %v1612_v4 = vld [vmem:[#allocation5 + $0x20] ss:$8 sps:$4 sm:$0xff]  }
  0x3f   :  { %167 = vmatpush1.bf16.msra.mxu0 %v1609_v2  ;;  %v1613_v5 = vld [vmem:[#allocation5 + $0x14] ss:$8 sps:$4 sm:$0xff]   ;;  %v1615_v6 = vld [vmem:[#allocation5 + $0x10] ss:$8 sps:$4 sm:$0xff]   ;;  %v1622_v9 = vld [vmem:[#allocation7 + $0x64] ss:$8 sps:$4 sm:$0xff]  }
  0x40   :  { %168 = vmatprep.subr.bf16.mxu0 %v1610_v3  ;;  %v1619_v7 = vld [vmem:[#allocation7 + $0x74] ss:$8 sps:$4 sm:$0xff]   ;;  %v1621_v8 = vld [vmem:[#allocation7 + $0x70] ss:$8 sps:$4 sm:$0xff]   ;;  %v1616_v10 = vld [vmem:[#allocation5 + $0x4] ss:$8 sps:$4 sm:$0xff]  }
  0x41   :  { %407 = vmatprep.subr.bf16.mxu1 %v1619_v7  ;;  %v1624_v11 = vld [vmem:[#allocation7 + $0x60] ss:$8 sps:$4 sm:$0xff]   ;;  %v1625_v13 = vld [vmem:[#allocation7 + $0x54] ss:$8 sps:$4 sm:$0xff]   ;;  %v1627_v15 = vld [vmem:[#allocation7 + $0x50] ss:$8 sps:$4 sm:$0xff]  }
  0x42   :  { %408 = vmatpush1.bf16.msra.mxu1 %v1621_v8  ;;  %v1618_v12 = vld [vmem:[#allocation5] ss:$8 sps:$4 sm:$0xff]   ;;  %v92_v14 = vld [vmem:[#allocation2] sm:$0xff]  ;;  %v1628_v17 = vld [vmem:[#allocation7 + $0x44] ss:$8 sps:$4 sm:$0xff]   ;;  %v104_v8 = vlaneseq }
  0x43   :  { %169 = vmatpush1.bf16.msra.mxu0 %v1612_v4  ;;  %409 = vmatprep.subr.bf16.mxu1 %v1622_v9  ;;  %v93_v16 = vpack.c.bf16 %v92_v14, %v92_v14  ;;  %v1630_v18 = vld [vmem:[#allocation7 + $0x40] ss:$8 sps:$4 sm:$0xff]   ;;  %v1631_v19 = vld [vmem:[#allocation7 + $0x34] ss:$8 sps:$4 sm:$0xff]   ;;  %v1633_v20 = vld [vmem:[#allocation7 + $0x30] ss:$8 sps:$4 sm:$0xff]  }
  0x44   :  { %170 = vmatprep.subr.bf16.mxu0 %v1613_v5  ;;  %v1634_v21 = vld [vmem:[#allocation7 + $0x24] ss:$8 sps:$4 sm:$0xff]   ;;  %v1636_v22 = vld [vmem:[#allocation7 + $0x20] ss:$8 sps:$4 sm:$0xff]   ;;  %v1637_v23 = vld [vmem:[#allocation7 + $0x14] ss:$8 sps:$4 sm:$0xff]  }
  0x45   :  { %v1639_v24 = vld [vmem:[#allocation7 + $0x10] ss:$8 sps:$4 sm:$0xff]   ;;  %v1640_v25 = vld [vmem:[#allocation7 + $0x4] ss:$8 sps:$4 sm:$0xff]   ;;  %v1642_v26 = vld [vmem:[#allocation7] ss:$8 sps:$4 sm:$0xff]  }
  0x46   :  { %410 = vmatpush1.bf16.msra.mxu1 %v1624_v11  ;;  %v1643_v27 = vld [vmem:[#allocation7 + $0xf4] ss:$8 sps:$4 sm:$0xff]   ;;  %v1645_v28 = vld [vmem:[#allocation7 + $0xf0] ss:$8 sps:$4 sm:$0xff]   ;;  %v1646_v29 = vld [vmem:[#allocation7 + $0xe4] ss:$8 sps:$4 sm:$0xff]  }
  0x47   :  { %171 = vmatpush1.bf16.msra.mxu0 %v1615_v6  ;;  %411 = vmatprep.subr.bf16.mxu1 %v1625_v13  ;;  %v1648_v30 = vld [vmem:[#allocation7 + $0xe0] ss:$8 sps:$4 sm:$0xff]   ;;  %v1649_v31 = vld [vmem:[#allocation7 + $0xd4] ss:$8 sps:$4 sm:$0xff]   ;;  %v1651_v32 = vld [vmem:[#allocation7 + $0xd0] ss:$8 sps:$4 sm:$0xff]  }
  0x48   :  { %172 = vmatprep.subr.bf16.mxu0 %v1616_v10  ;;  %v1652_v33 = vld [vmem:[#allocation7 + $0xc4] ss:$8 sps:$4 sm:$0xff]   ;;  %v1654_v34 = vld [vmem:[#allocation7 + $0xc0] ss:$8 sps:$4 sm:$0xff]   ;;  %v1655_v35 = vld [vmem:[#allocation7 + $0xb4] ss:$8 sps:$4 sm:$0xff]  }
  0x49   :  { %v1657_v36 = vld [vmem:[#allocation7 + $0xb0] ss:$8 sps:$4 sm:$0xff]   ;;  %v1658_v37 = vld [vmem:[#allocation7 + $0xa4] ss:$8 sps:$4 sm:$0xff]   ;;  %v1660_v38 = vld [vmem:[#allocation7 + $0xa0] ss:$8 sps:$4 sm:$0xff]  }
  0x4a   :  { %412 = vmatpush1.bf16.msra.mxu1 %v1627_v15  ;;  %v1661_v39 = vld [vmem:[#allocation7 + $0x94] ss:$8 sps:$4 sm:$0xff]   ;;  %v1663_v40 = vld [vmem:[#allocation7 + $0x90] ss:$8 sps:$4 sm:$0xff]   ;;  %v1664_v41 = vld [vmem:[#allocation7 + $0x84] ss:$8 sps:$4 sm:$0xff]  }
  0x4b   :  { %173 = vmatpush1.bf16.msra.mxu0 %v1618_v12  ;;  %413 = vmatprep.subr.bf16.mxu1 %v1628_v17  ;;  %v1666_v42 = vld [vmem:[#allocation7 + $0x80] ss:$8 sps:$4 sm:$0xff]   ;;  %v1672_v45 = vld [vmem:[#allocation10 + $0x194] ss:$28 sps:$4 sm:$0xff]   ;;  %v2041_v9 = vshrl.u32 %v104_v8, 7 }
  0x4c   :  { %v1667_v43 = vld [vmem:[#allocation10 + $0x188] ss:$28 sps:$4 sm:$0xff]   ;;  %v1675_v46 = vld [vmem:[#allocation10 + $0x154] ss:$28 sps:$4 sm:$0xff]   ;;  %v1681_v48 = vld [vmem:[#allocation10 + $0x11c] ss:$28 sps:$4 sm:$0xff]  }
  0x4d   :  { %v1669_v44 = vld [vmem:[#allocation10 + $0x18c] ss:$28 sps:$4 sm:$0xff]   ;;  %v1679_v49 = vld [vmem:[#allocation10 + $0x118] ss:$28 sps:$4 sm:$0xff]   ;;  %v1687_v50 = vld [vmem:[#allocation10 + $0xe4] ss:$28 sps:$4 sm:$0xff]  }
  0x4e   :  { %1421 = vmatmul.mubr.msk.bf16.vlgmr.msra.gmra.mxu0 %vm154_vm0, %v93_v16  ;;  %414 = vmatpush1.bf16.msra.mxu1 %v1630_v18  ;;  %v1673_v47 = vld [vmem:[#allocation10 + $0x150] ss:$28 sps:$4 sm:$0xff]   ;;  %v1685_v51 = vld [vmem:[#allocation10 + $0xe0] ss:$28 sps:$4 sm:$0xff]   ;;  %v1691_v53 = vld [vmem:[#allocation10 + $0xa8] ss:$28 sps:$4 sm:$0xff]  }
  0x4f   :  { %415 = vmatprep.subr.bf16.mxu1 %v1631_v19  ;;  %1193 = vmatprep.subr.bf16.mxu0 %v1669_v44  ;;  %v1693_v52 = vld [vmem:[#allocation10 + $0xac] ss:$28 sps:$4 sm:$0xff]   ;;  %v1699_v54 = vld [vmem:[#allocation10 + $0x74] ss:$28 sps:$4 sm:$0xff]   ;;  %v1705_v56 = vld [vmem:[#allocation10 + $0x3c] ss:$28 sps:$4 sm:$0xff]  }
  0x50   :  { %1194 = vmatpush1.bf16.msra.mxu0 %v1667_v43  ;;  %v1697_v55 = vld [vmem:[#allocation10 + $0x70] ss:$28 sps:$4 sm:$0xff]   ;;  %v1703_v57 = vld [vmem:[#allocation10 + $0x38] ss:$28 sps:$4 sm:$0xff]   ;;  %v1711_v58 = vld [vmem:[#allocation10 + $0x4] ss:$28 sps:$4 sm:$0xff]  }
  0x51   :  { %1195 = vmatprep.subr.bf16.mxu0 %v1675_v46  ;;  %v1709_v59 = vld [vmem:[#allocation10] ss:$28 sps:$4 sm:$0xff]   ;;  %v1717_v60 = vld [vmem:[#allocation10 + $0x34c] ss:$28 sps:$4 sm:$0xff]   ;;  %v1723_v62 = vld [vmem:[#allocation10 + $0x314] ss:$28 sps:$4 sm:$0xff]  }
  0x52   :  { %416 = vmatpush1.bf16.msra.mxu1 %v1633_v20  ;;  %v1715_v61 = vld [vmem:[#allocation10 + $0x348] ss:$28 sps:$4 sm:$0xff]   ;;  %v1721_v63 = vld [vmem:[#allocation10 + $0x310] ss:$28 sps:$4 sm:$0xff]   ;;  %v1729_v0 = vld [vmem:[#allocation10 + $0x2dc] ss:$28 sps:$4 sm:$0xff]  }
  0x53   :  { %417 = vmatprep.subr.bf16.mxu1 %v1634_v21  ;;  %v1727_v1 = vld [vmem:[#allocation10 + $0x2d8] ss:$28 sps:$4 sm:$0xff]   ;;  %v1735_v2 = vld [vmem:[#allocation10 + $0x2a4] ss:$28 sps:$4 sm:$0xff]   ;;  %v1741_v4 = vld [vmem:[#allocation10 + $0x26c] ss:$28 sps:$4 sm:$0xff]  }
  0x54   :  { %1196 = vmatpush1.bf16.msra.mxu0 %v1673_v47  ;;  %v1733_v3 = vld [vmem:[#allocation10 + $0x2a0] ss:$28 sps:$4 sm:$0xff]   ;;  %v1739_v5 = vld [vmem:[#allocation10 + $0x268] ss:$28 sps:$4 sm:$0xff]   ;;  %v1747_v6 = vld [vmem:[#allocation10 + $0x234] ss:$28 sps:$4 sm:$0xff]  }
  0x55   :  { %1197 = vmatprep.subr.bf16.mxu0 %v1681_v48  ;;  %v1745_v7 = vld [vmem:[#allocation10 + $0x230] ss:$28 sps:$4 sm:$0xff]   ;;  %v2044_v10 = vsub.s32 0, %v2041_v9  ;;  %v102_v11 = vld [vmem:[%s2077_s2] sm:$0x3]  ;;  %v2050_v12 = vsub.s32 1, %v2041_v9 }
  0x56   :  { %418 = vmatpush1.bf16.msra.mxu1 %v1636_v22  ;;  %v1724_v43 = vld [vmem:[#allocation10 + $0x318] ss:$28 sps:$4 sm:$0xff]   ;;  %v1732_v44 = vld [vmem:[#allocation10 + $0x2e4] ss:$28 sps:$4 sm:$0xff]   ;;  %v1738_v46 = vld [vmem:[#allocation10 + $0x2ac] ss:$28 sps:$4 sm:$0xff]  }
  0x57   :  { %419 = vmatprep.subr.bf16.mxu1 %v1637_v23  ;;  %v107_v13 = vrot.slane %v102_v11, %v2044_v10  ;;  %v111_v14 = vrot.slane %v102_v11, %v2050_v12  ;;  %v1736_v47 = vld [vmem:[#allocation10 + $0x2a8] ss:$28 sps:$4 sm:$0xff]   ;;  %v1744_v48 = vld [vmem:[#allocation10 + $0x274] ss:$28 sps:$4 sm:$0xff]  }
  0x58   :  { %1198 = vmatpush1.bf16.msra.mxu0 %v1679_v49  ;;  %v1742_v49 = vld [vmem:[#allocation10 + $0x270] ss:$28 sps:$4 sm:$0xff]  }
  0x59   :  { %1199 = vmatprep.subr.bf16.mxu0 %v1687_v50  ;;  %v1750_v50 = vld [vmem:[#allocation10 + $0x23c] ss:$28 sps:$4 sm:$0xff]  }
  0x5a   :  { %420 = vmatpush1.bf16.msra.mxu1 %v1639_v24  ;;  %v1670_v24 = vld [vmem:[#allocation10 + $0x190] ss:$28 sps:$4 sm:$0xff]  }
  0x5b   :  { %421 = vmatprep.subr.bf16.mxu1 %v1640_v25 }
  0x5c   :  { %1200 = vmatpush1.bf16.msra.mxu0 %v1685_v51  ;;  %v1748_v51 = vld [vmem:[#allocation10 + $0x238] ss:$28 sps:$4 sm:$0xff]  }
  0x5d   :  { %1201 = vmatprep.subr.bf16.mxu0 %v1693_v52  ;;  %v1753_v52 = vld [vmem:[#allocation10 + $0x1fc] ss:$28 sps:$4 sm:$0xff]  }
  0x5e   :  { %422 = vmatpush1.bf16.msra.mxu1 %v1642_v26  ;;  %v1678_v26 = vld [vmem:[#allocation10 + $0x15c] ss:$28 sps:$4 sm:$0xff]  }
  0x5f   :  { %423 = vmatprep.subr.bf16.mxu1 %v1643_v27  ;;  %v1676_v27 = vld [vmem:[#allocation10 + $0x158] ss:$28 sps:$4 sm:$0xff]  }
  0x60   :  { %1202 = vmatpush1.bf16.msra.mxu0 %v1691_v53  ;;  %v1756_v53 = vld [vmem:[#allocation10 + $0x204] ss:$28 sps:$4 sm:$0xff]  }
  0x61   :  { %1203 = vmatprep.subr.bf16.mxu0 %v1699_v54  ;;  %v1751_v54 = vld [vmem:[#allocation10 + $0x1f8] ss:$28 sps:$4 sm:$0xff]  }
  0x62   :  { %424 = vmatpush2.bf16.msra.mxu1 %v1645_v28  ;;  %v1684_v28 = vld [vmem:[#allocation10 + $0x124] ss:$28 sps:$4 sm:$0xff]  }
  0x63   :  { %425 = vmatprep.subr.bf16.mxu1 %v1646_v29  ;;  %v1682_v29 = vld [vmem:[#allocation10 + $0x120] ss:$28 sps:$4 sm:$0xff]  }
  0x64   :  { %1204 = vmatpush1.bf16.msra.mxu0 %v1697_v55  ;;  %v1754_v55 = vld [vmem:[#allocation10 + $0x200] ss:$28 sps:$4 sm:$0xff]  }
  0x65   :  { %1205 = vmatprep.subr.bf16.mxu0 %v1705_v56  ;;  %v1759_v56 = vld [vmem:[#allocation10 + $0x1c4] ss:$28 sps:$4 sm:$0xff]  }
  0x66   :  { %426 = vmatpush2.bf16.msra.mxu1 %v1648_v30  ;;  %v1690_v30 = vld [vmem:[#allocation10 + $0xec] ss:$28 sps:$4 sm:$0xff]  }
  0x67   :  { %427 = vmatprep.subr.bf16.mxu1 %v1649_v31  ;;  %v1688_v31 = vld [vmem:[#allocation10 + $0xe8] ss:$28 sps:$4 sm:$0xff]  }
  0x68   :  { %1206 = vmatpush1.bf16.msra.mxu0 %v1703_v57  ;;  %v1762_v57 = vld [vmem:[#allocation10 + $0x1cc] ss:$28 sps:$4 sm:$0xff]  }
  0x69   :  { %1207 = vmatprep.subr.bf16.mxu0 %v1711_v58  ;;  %v1757_v58 = vld [vmem:[#allocation10 + $0x1c0] ss:$28 sps:$4 sm:$0xff]  }
  0x6a   :  { %428 = vmatpush2.bf16.msra.mxu1 %v1651_v32  ;;  %v1696_v32 = vld [vmem:[#allocation10 + $0xb4] ss:$28 sps:$4 sm:$0xff]  }
  0x6b   :  { %429 = vmatprep.subr.bf16.mxu1 %v1652_v33  ;;  %v1694_v33 = vld [vmem:[#allocation10 + $0xb0] ss:$28 sps:$4 sm:$0xff]  }
  0x6c   :  { %1208 = vmatpush1.bf16.msra.mxu0 %v1709_v59  ;;  %v1760_v59 = vld [vmem:[#allocation10 + $0x1c8] ss:$28 sps:$4 sm:$0xff]  }
  0x6d   :  { %1209 = vmatprep.subr.bf16.mxu0 %v1717_v60  ;;  %v1765_v60 = vld [vmem:[#allocation10 + $0x19c] ss:$28 sps:$4 sm:$0xff]  }
  0x6e   :  { %430 = vmatpush2.bf16.msra.mxu1 %v1654_v34  ;;  %v1702_v34 = vld [vmem:[#allocation10 + $0x7c] ss:$28 sps:$4 sm:$0xff]  }
  0x6f   :  { %431 = vmatprep.subr.bf16.mxu1 %v1655_v35  ;;  %v1700_v35 = vld [vmem:[#allocation10 + $0x78] ss:$28 sps:$4 sm:$0xff]  }
  0x70   :  { %1210 = vmatpush2.bf16.msra.mxu0 %v1715_v61  ;;  %v1766_v61 = vld [vmem:[#allocation10 + $0x360] ss:$28 sps:$4 sm:$0xff]  }
  0x71   :  { %1211 = vmatprep.subr.bf16.mxu0 %v1723_v62  ;;  %v235_v62 = vld [vmem:[#allocation8] sm:$0x3] }
  0x72   :  { %432 = vmatpush2.bf16.msra.mxu1 %v1657_v36  ;;  %v1708_v36 = vld [vmem:[#allocation10 + $0x44] ss:$28 sps:$4 sm:$0xff]  }
  0x73   :  { %433 = vmatprep.subr.bf16.mxu1 %v1658_v37  ;;  %v1706_v37 = vld [vmem:[#allocation10 + $0x40] ss:$28 sps:$4 sm:$0xff]  }
  0x74   :  { %1212 = vmatpush2.bf16.msra.mxu0 %v1721_v63  ;;  %v240_v63 = vrot.slane %v235_v62, %v2044_v10 }
  0x75   :  { %1213 = vmatprep.subr.bf16.mxu0 %v1729_v0  ;;  %v244_v0 = vrot.slane %v235_v62, %v2050_v12  ;;  %v596_v62 = vsub.s32 3, %v2041_v9 }
  0x76   :  { %434 = vmatpush2.bf16.msra.mxu1 %v1660_v38  ;;  %v1714_v38 = vld [vmem:[#allocation10 + $0xc] ss:$28 sps:$4 sm:$0xff]  }
  0x77   :  { %435 = vmatprep.subr.bf16.mxu1 %v1661_v39  ;;  %v1712_v39 = vld [vmem:[#allocation10 + $0x8] ss:$28 sps:$4 sm:$0xff]  }
  0x78   :  { %1214 = vmatpush2.bf16.msra.mxu0 %v1727_v1 }
  0x79   :  { %1215 = vmatprep.subr.bf16.mxu0 %v1735_v2 }
  0x7a   :  { %436 = vmatpush2.bf16.msra.mxu1 %v1663_v40  ;;  %v1720_v40 = vld [vmem:[#allocation10 + $0x354] ss:$28 sps:$4 sm:$0xff]  }
  0x7b   :  { %437 = vmatprep.subr.bf16.mxu1 %v1664_v41  ;;  %v1718_v41 = vld [vmem:[#allocation10 + $0x350] ss:$28 sps:$4 sm:$0xff]  }
  0x7c   :  { %1216 = vmatpush2.bf16.msra.mxu0 %v1733_v3 }
  0x7d   :  { %1217 = vmatprep.subr.bf16.mxu0 %v1741_v4 }
  0x7e   :  { %438 = vmatpush2.bf16.msra.mxu1 %v1666_v42  ;;  %v1726_v42 = vld [vmem:[#allocation10 + $0x31c] ss:$28 sps:$4 sm:$0xff]  }
  0x7f   :  { %1234 = vmatprep.subr.bf16.mxu1 %v1672_v45  ;;  %v1730_v45 = vld [vmem:[#allocation10 + $0x2e0] ss:$28 sps:$4 sm:$0xff]  }
  0x80   :  { %1218 = vmatpush2.bf16.msra.mxu0 %v1739_v5 }
  0x81   :  { %1219 = vmatprep.subr.bf16.mxu0 %v1747_v6 }
  0x84   :  { %1220 = vmatpush2.bf16.msra.mxu0 %v1745_v7 }
  0x85   :  { %1221 = vmatprep.subr.bf16.mxu0 %v1753_v52  ;;  %v1817_v52 = vld [vmem:[#allocation10 + $0x27c] ss:$28 sps:$4 sm:$0xff]  }
  0x88   :  { %1222 = vmatpush2.bf16.msra.mxu0 %v1751_v54  ;;  %v1820_v54 = vld [vmem:[#allocation10 + $0x244] ss:$28 sps:$4 sm:$0xff]  }
  0x89   :  { %1223 = vmatprep.subr.bf16.mxu0 %v1759_v56  ;;  %v1823_v56 = vld [vmem:[#allocation10 + $0x20c] ss:$28 sps:$4 sm:$0xff]  }
  0x8c   :  { %1224 = vmatpush2.bf16.msra.mxu0 %v1757_v58  ;;  %v1826_v58 = vld [vmem:[#allocation10 + $0x1d4] ss:$28 sps:$4 sm:$0xff]  }
  0x8d   :  { %1275 = vmatprep.subr.bf16.mxu0 %v1765_v60  ;;  %v592_v60 = vsub.s32 2, %v2041_v9 }
 0x10e   :  { %v192_v15 = vpop.f32.mrf.mxu0 }
 0x10f   :  { %v193_v16 = vadd.f32 %v192_v15, %v107_v13  ;;  %v1763_v13 = vld [vmem:[#allocation10 + $0x198] ss:$28 sps:$4 sm:$0xff]  }
 0x110   :  { %v194_v17 = vpop.f32.mrf.mxu0 }
 0x111   :  { %v195_v18 = vadd.f32 %v194_v17, %v111_v14  ;;  %v199_v19 = vmax.f32 %v193_v16, 0.0  ;;  %v1767_v14 = vld [vmem:[#allocation10 + $0x1a0] ss:$28 sps:$4 sm:$0xff]   ;;  %v1771_v17 = vld [vmem:[#allocation10 + $0x328] ss:$28 sps:$4 sm:$0xff]  }
 0x112   :  { %v196_v20 = vpop.f32.mrf.mxu0  ;;  %v1770_v16 = vld [vmem:[#allocation10 + $0x164] ss:$28 sps:$4 sm:$0xff]  }
 0x113   :  { %v200_v21 = vmax.f32 %v195_v18, 0.0  ;;  %v201_v25 = vpack.c.bf16 %v199_v19, %v199_v19  ;;  %v1768_v18 = vld [vmem:[#allocation10 + $0x160] ss:$28 sps:$4 sm:$0xff]   ;;  %v1772_v19 = vld [vmem:[#allocation10 + $0x168] ss:$28 sps:$4 sm:$0xff]  }
 0x114   :  { %v197_v22 = vpop.f32.mrf.mxu0  ;;  %v1775_v20 = vld [vmem:[#allocation10 + $0x12c] ss:$28 sps:$4 sm:$0xff]  }
 0x115   :  { %v202_v23 = vpack.c.bf16 %v200_v21, %v200_v21  ;;  %v1776_v21 = vld [vmem:[#allocation10 + $0x2f0] ss:$28 sps:$4 sm:$0xff]   ;;  %v1773_v22 = vld [vmem:[#allocation10 + $0x128] ss:$28 sps:$4 sm:$0xff]  }
 0x117   :  { %439 = vmatprep.mubr.bf16.mxu1 %v202_v23  ;;  %v1777_v23 = vld [vmem:[#allocation10 + $0x130] ss:$28 sps:$4 sm:$0xff]  }
 0x118   :  { %440 = vmatmul.mubr.bf16.vlgmr.msra.gmra.mxu1 %v201_v25  ;;  %v1781_v25 = vld [vmem:[#allocation10 + $0x2b8] ss:$28 sps:$4 sm:$0xff]  }
 0x119   :  { %1235 = vmatpush1.bf16.msra.mxu1 %v1670_v24  ;;  %v1780_v24 = vld [vmem:[#allocation10 + $0xf4] ss:$28 sps:$4 sm:$0xff]  }
 0x11a   :  { %1236 = vmatprep.subr.bf16.mxu1 %v1678_v26  ;;  %v1778_v26 = vld [vmem:[#allocation10 + $0xf0] ss:$28 sps:$4 sm:$0xff]  }
 0x11d   :  { %1237 = vmatpush1.bf16.msra.mxu1 %v1676_v27  ;;  %v1782_v27 = vld [vmem:[#allocation10 + $0xf8] ss:$28 sps:$4 sm:$0xff]  }
 0x11e   :  { %1238 = vmatprep.subr.bf16.mxu1 %v1684_v28  ;;  %v1785_v28 = vld [vmem:[#allocation10 + $0xbc] ss:$28 sps:$4 sm:$0xff]  }
 0x121   :  { %1239 = vmatpush1.bf16.msra.mxu1 %v1682_v29  ;;  %v1786_v29 = vld [vmem:[#allocation10 + $0x280] ss:$28 sps:$4 sm:$0xff]  }
 0x122   :  { %1240 = vmatprep.subr.bf16.mxu1 %v1690_v30  ;;  %v1783_v30 = vld [vmem:[#allocation10 + $0xb8] ss:$28 sps:$4 sm:$0xff]  }
 0x125   :  { %1241 = vmatpush1.bf16.msra.mxu1 %v1688_v31  ;;  %v1787_v31 = vld [vmem:[#allocation10 + $0xc0] ss:$28 sps:$4 sm:$0xff]  }
 0x126   :  { %1242 = vmatprep.subr.bf16.mxu1 %v1696_v32  ;;  %v1790_v32 = vld [vmem:[#allocation10 + $0x84] ss:$28 sps:$4 sm:$0xff]  }
 0x129   :  { %1243 = vmatpush1.bf16.msra.mxu1 %v1694_v33  ;;  %v1791_v33 = vld [vmem:[#allocation10 + $0x248] ss:$28 sps:$4 sm:$0xff]  }
 0x12a   :  { %1244 = vmatprep.subr.bf16.mxu1 %v1702_v34  ;;  %v1788_v34 = vld [vmem:[#allocation10 + $0x80] ss:$28 sps:$4 sm:$0xff]  }
 0x12d   :  { %1245 = vmatpush1.bf16.msra.mxu1 %v1700_v35  ;;  %v1792_v35 = vld [vmem:[#allocation10 + $0x88] ss:$28 sps:$4 sm:$0xff]  }
 0x12e   :  { %1246 = vmatprep.subr.bf16.mxu1 %v1708_v36  ;;  %v1795_v36 = vld [vmem:[#allocation10 + $0x4c] ss:$28 sps:$4 sm:$0xff]  }
 0x131   :  { %1247 = vmatpush1.bf16.msra.mxu1 %v1706_v37  ;;  %v1796_v37 = vld [vmem:[#allocation10 + $0x210] ss:$28 sps:$4 sm:$0xff]  }
 0x132   :  { %1248 = vmatprep.subr.bf16.mxu1 %v1714_v38  ;;  %v1793_v38 = vld [vmem:[#allocation10 + $0x48] ss:$28 sps:$4 sm:$0xff]  }
 0x135   :  { %1249 = vmatpush1.bf16.msra.mxu1 %v1712_v39  ;;  %v1797_v39 = vld [vmem:[#allocation10 + $0x50] ss:$28 sps:$4 sm:$0xff]  }
 0x136   :  { %1250 = vmatprep.subr.bf16.mxu1 %v1720_v40  ;;  %v1800_v40 = vld [vmem:[#allocation10 + $0x14] ss:$28 sps:$4 sm:$0xff]  }
 0x139   :  { %1251 = vmatpush2.bf16.msra.mxu1 %v1718_v41  ;;  %v1801_v41 = vld [vmem:[#allocation10 + $0x1d8] ss:$28 sps:$4 sm:$0xff]  }
 0x13a   :  { %1252 = vmatprep.subr.bf16.mxu1 %v1726_v42  ;;  %v1798_v42 = vld [vmem:[#allocation10 + $0x10] ss:$28 sps:$4 sm:$0xff]  }
 0x13d   :  { %1253 = vmatpush2.bf16.msra.mxu1 %v1724_v43  ;;  %v1802_v43 = vld [vmem:[#allocation10 + $0x18] ss:$28 sps:$4 sm:$0xff]  }
 0x13e   :  { %1254 = vmatprep.subr.bf16.mxu1 %v1732_v44  ;;  %v1805_v44 = vld [vmem:[#allocation10 + $0x35c] ss:$28 sps:$4 sm:$0xff]  }
 0x141   :  { %1255 = vmatpush2.bf16.msra.mxu1 %v1730_v45  ;;  %v1803_v45 = vld [vmem:[#allocation10 + $0x358] ss:$28 sps:$4 sm:$0xff]  }
 0x142   :  { %1256 = vmatprep.subr.bf16.mxu1 %v1738_v46  ;;  %v1808_v46 = vld [vmem:[#allocation10 + $0x324] ss:$28 sps:$4 sm:$0xff]  }
 0x145   :  { %1257 = vmatpush2.bf16.msra.mxu1 %v1736_v47  ;;  %v1806_v47 = vld [vmem:[#allocation10 + $0x320] ss:$28 sps:$4 sm:$0xff]  }
 0x146   :  { %1258 = vmatprep.subr.bf16.mxu1 %v1744_v48  ;;  %v1811_v48 = vld [vmem:[#allocation10 + $0x2ec] ss:$28 sps:$4 sm:$0xff]  }
 0x149   :  { %1259 = vmatpush2.bf16.msra.mxu1 %v1742_v49  ;;  %v1809_v49 = vld [vmem:[#allocation10 + $0x2e8] ss:$28 sps:$4 sm:$0xff]  }
 0x14a   :  { %1260 = vmatprep.subr.bf16.mxu1 %v1750_v50  ;;  %v1814_v50 = vld [vmem:[#allocation10 + $0x2b4] ss:$28 sps:$4 sm:$0xff]  }
 0x14d   :  { %1261 = vmatpush2.bf16.msra.mxu1 %v1748_v51  ;;  %v1812_v51 = vld [vmem:[#allocation10 + $0x2b0] ss:$28 sps:$4 sm:$0xff]  }
 0x14e   :  { %1262 = vmatprep.subr.bf16.mxu1 %v1756_v53  ;;  %v1815_v53 = vld [vmem:[#allocation10 + $0x278] ss:$28 sps:$4 sm:$0xff]  }
 0x151   :  { %1263 = vmatpush2.bf16.msra.mxu1 %v1754_v55  ;;  %v1818_v55 = vld [vmem:[#allocation10 + $0x240] ss:$28 sps:$4 sm:$0xff]  }
 0x152   :  { %1264 = vmatprep.subr.bf16.mxu1 %v1762_v57  ;;  %v1821_v57 = vld [vmem:[#allocation10 + $0x208] ss:$28 sps:$4 sm:$0xff]  }
 0x155   :  { %1265 = vmatpush2.bf16.msra.mxu1 %v1760_v59  ;;  %v1824_v59 = vld [vmem:[#allocation10 + $0x1d0] ss:$28 sps:$4 sm:$0xff]  }
 0x156   :  { %1574 = vmatprep.subr.bf16.mxu1 %v1766_v61  ;;  %v580_v61 = vld [vmem:[%s2081_s6] sm:$0xff]  ;;  %s1979_s6 = smov [#allocation11]  }
 0x157   :  { %s1402_s28 = sshll.u32 %s1979_s6, 4  ;;  %s1403_s28 = int_to_ptr.vmem [resolvable:$true] %s1402_s28 }
 0x158   :  { %s1941_s29 = scalar_lea.vmem %s1403_s28, 448  ;;  %p1946_p12 = scmp.lt.s32.totalorder %s1403_s28, %s1403_s28 }
 0x159   :  { %p1942_p11 = scmp.ne.s32.totalorder %s1403_s28, %s1941_s29  ;;  %p1947_p13 = scmp.lt.s32.totalorder %s1941_s29, %s1941_s29 }
 0x15b   :  { %p1948_p0 = por %p1947_p13, %p1946_p12 }
 0x15d   :  { %p1949_p1 = pnand %p1948_p0, %p1942_p11 }
 0x1d8   :  { %v441_v1 = vpop.f32.mrf.mxu1 }
 0x1d9   :  { %v442_v2 = vadd.f32 %v441_v1, %v240_v63  ;;  %v585_v63 = vrot.slane %v580_v61, %v2044_v10  ;;  %v589_v1 = vrot.slane %v580_v61, %v2050_v12 }
 0x1da   :  { %v443_v3 = vpop.f32.mrf.mxu1 }
 0x1db   :  { %v444_v4 = vadd.f32 %v443_v3, %v244_v0  ;;  %v448_v5 = vmax.f32 %v442_v2, 0.0  ;;  %v593_v0 = vrot.slane %v580_v61, %v592_v60  ;;  %v597_v2 = vrot.slane %v580_v61, %v596_v62 }
 0x1dc   :  { %v445_v6 = vpop.f32.mrf.mxu1 }
 0x1dd   :  { %v449_v7 = vmax.f32 %v444_v4, 0.0  ;;  %v2056_v15 = vpack.c.bf16 %v448_v5, %v448_v5 }
 0x1de   :  { %v446_v8 = vpop.f32.mrf.mxu1 }
 0x1df   :  { %v451_v11 = vpack.c.bf16 %v449_v7, %v449_v7 }
 0x1e1   :  { %1225 = vmatprep.mubr.bf16.mxu0 %v451_v11  ;;  %1266 = vmatprep.mubr.bf16.mxu1 %v451_v11 }
 0x1e2   :  { %1226 = vmatmul.mubr.bf16.vlgmr.msra.gmra.mxu0 %v2056_v15  ;;  %1267 = vmatmul.mubr.bf16.vlgmr.msra.gmra.mxu1 %v2056_v15 }
 0x1e3   :  { %1276 = vmatpush1.bf16.msra.mxu0 %v1763_v13  ;;  %1575 = vmatpush3.bf16.msra.mxu1 %v1767_v14 }
 0x1e4   :  { %1307 = vmatprep.mubr.bf16.mxu0 %v451_v11  ;;  %1348 = vmatprep.mubr.bf16.mxu1 %v451_v11 }
 0x1e5   :  { %1277 = vmatprep.subr.bf16.mxu0 %v1770_v16  ;;  %1576 = vmatprep.subr.bf16.mxu1 %v1771_v17 }
 0x1e7   :  { %1278 = vmatpush1.bf16.msra.mxu0 %v1768_v18  ;;  %1577 = vmatpush3.bf16.msra.mxu1 %v1772_v19 }
 0x1e8   :  { %1279 = vmatprep.subr.bf16.mxu0 %v1775_v20  ;;  %1578 = vmatprep.subr.bf16.mxu1 %v1776_v21 }
 0x1eb   :  { %1280 = vmatpush1.bf16.msra.mxu0 %v1773_v22  ;;  %1579 = vmatpush3.bf16.msra.mxu1 %v1777_v23  ;;  %v608_v22 = vsub.s32 6, %v2041_v9 }
 0x1ec   :  { %1281 = vmatprep.subr.bf16.mxu0 %v1780_v24  ;;  %1580 = vmatprep.subr.bf16.mxu1 %v1781_v25 }
 0x1ed   :  { %v609_v24 = vrot.slane %v580_v61, %v608_v22 }
 0x1ef   :  { %1282 = vmatpush1.bf16.msra.mxu0 %v1778_v26  ;;  %1581 = vmatpush3.bf16.msra.mxu1 %v1782_v27 }
 0x1f0   :  { %1283 = vmatprep.subr.bf16.mxu0 %v1785_v28  ;;  %1582 = vmatprep.subr.bf16.mxu1 %v1786_v29 }
 0x1f3   :  { %1284 = vmatpush1.bf16.msra.mxu0 %v1783_v30  ;;  %1583 = vmatpush3.bf16.msra.mxu1 %v1787_v31 }
 0x1f4   :  { %1285 = vmatprep.subr.bf16.mxu0 %v1790_v32  ;;  %1584 = vmatprep.subr.bf16.mxu1 %v1791_v33  ;;  %v600_v32 = vsub.s32 4, %v2041_v9  ;;  %v604_v33 = vsub.s32 5, %v2041_v9 }
 0x1f7   :  { %1286 = vmatpush1.bf16.msra.mxu0 %v1788_v34  ;;  %1585 = vmatpush3.bf16.msra.mxu1 %v1792_v35  ;;  %v601_v34 = vrot.slane %v580_v61, %v600_v32  ;;  %v605_v35 = vrot.slane %v580_v61, %v604_v33 }
 0x1f8   :  { %1287 = vmatprep.subr.bf16.mxu0 %v1795_v36  ;;  %1586 = vmatprep.subr.bf16.mxu1 %v1796_v37 }
 0x1fb   :  { %1288 = vmatpush1.bf16.msra.mxu0 %v1793_v38  ;;  %1587 = vmatpush3.bf16.msra.mxu1 %v1797_v39 }
 0x1fc   :  { %1289 = vmatprep.subr.bf16.mxu0 %v1800_v40  ;;  %1588 = vmatprep.subr.bf16.mxu1 %v1801_v41 }
 0x1ff   :  { %1290 = vmatpush1.bf16.msra.mxu0 %v1798_v42  ;;  %1589 = vmatpush3.bf16.msra.mxu1 %v1802_v43 }
 0x200   :  { %1291 = vmatprep.subr.bf16.mxu0 %v1805_v44 }
 0x202   :  { %1349 = vmatmul.mubr.bf16.vlgmr.msra.gmra.mxu1 %v2056_v15 }
 0x203   :  { %1292 = vmatpush2.bf16.msra.mxu0 %v1803_v45 }
 0x204   :  { %1293 = vmatprep.subr.bf16.mxu0 %v1808_v46 }
 0x207   :  { %1294 = vmatpush2.bf16.msra.mxu0 %v1806_v47 }
 0x208   :  { %1295 = vmatprep.subr.bf16.mxu0 %v1811_v48 }
 0x20b   :  { %1296 = vmatpush2.bf16.msra.mxu0 %v1809_v49 }
 0x20c   :  { %1297 = vmatprep.subr.bf16.mxu0 %v1814_v50 }
 0x20f   :  { %1298 = vmatpush2.bf16.msra.mxu0 %v1812_v51 }
 0x210   :  { %1299 = vmatprep.subr.bf16.mxu0 %v1817_v52 }
 0x213   :  { %1300 = vmatpush2.bf16.msra.mxu0 %v1815_v53 }
 0x214   :  { %1301 = vmatprep.subr.bf16.mxu0 %v1820_v54 }
 0x217   :  { %1302 = vmatpush2.bf16.msra.mxu0 %v1818_v55 }
 0x218   :  { %1303 = vmatprep.subr.bf16.mxu0 %v1823_v56 }
 0x21b   :  { %1304 = vmatpush2.bf16.msra.mxu0 %v1821_v57 }
 0x21c   :  { %1305 = vmatprep.subr.bf16.mxu0 %v1826_v58 }
 0x21f   :  { %1306 = vmatpush2.bf16.msra.mxu0 %v1824_v59 }
 0x222   :  { %1308 = vmatmul.mubr.bf16.vlgmr.msra.gmra.mxu0 %v2056_v15 }
 0x2a2   :  { %v1227_v3 = vpop.f32.mrf.mxu0  ;;  %v1268_v4 = vpop.f32.mrf.mxu1 }
 0x2a3   :  { %v1228_v5 = vadd.f32 %v1227_v3, %v585_v63  ;;  %v1269_v6 = vadd.f32 %v1268_v4, %v593_v0 }
 0x2a4   :  { %v1229_v7 = vpop.f32.mrf.mxu0  ;;  %v1270_v8 = vpop.f32.mrf.mxu1 }
 0x2a5   :  { %1827 = vtanh.f32 %v1228_v5  ;;  %v1230_v11 = vadd.f32 %v1229_v7, %v589_v1  ;;  %v1271_v13 = vadd.f32 %v1270_v8, %v597_v2 }
 0x2a6   :  { %1829 = vtanh.f32 %v1269_v6  ;;  %v1231_v14 = vpop.f32.mrf.mxu0  ;;  %v1272_v15 = vpop.f32.mrf.mxu1 }
 0x2a7   :  { %1831 = vtanh.f32 %v1230_v11 }
 0x2a8   :  { %1833 = vtanh.f32 %v1271_v13  ;;  %v1232_v16 = vpop.f32.mrf.mxu0  ;;  %v1273_v10 = vpop.f32.mrf.mxu1 }
 0x2b2   :  { %v1828_v17 = vpop.eup %1827 }
 0x2b3   :  { %v1830_v18 = vpop.eup %1829 }
 0x2b4   :  { %v1832_v12 = vpop.eup %1831 }
 0x2b5   :  { %v1834_v19 = vpop.eup %1833  ;;  %v1570_v20 = vpack.c.bf16 %v1832_v12, %v1828_v17 }
 0x2b6   :  { %v1571_v21 = vpack.c.bf16 %v1834_v19, %v1830_v18 }
 0x2b7   :  { %1392 = vst [vmem:[#allocation11] sm:$0xff] %v1570_v20 }
 0x2b8   :  { %1393 = vst [vmem:[#allocation11 + $0x8] sm:$0xff] %v1571_v21 }
 0x2c2   :  { %v1590_v23 = vpop.f32.mrf.mxu1 }
 0x2c4   :  { %v1591_v25 = vpop.f32.mrf.mxu1 }
 0x2c5   :  { %v1592_v26 = vadd.f32 %v1591_v25, %v1590_v23 }
 0x2c6   :  { %v1593_v27 = vpop.f32.mrf.mxu1 }
 0x2c7   :  { %v1351_v28 = vadd.f32 %v1592_v26, %v609_v24 }
 0x2c8   :  { %v1594_v29 = vpop.f32.mrf.mxu1 }
 0x2c9   :  { %1835 = vtanh.f32 %v1351_v28 }
 0x2d6   :  { %v1836_v30 = vpop.eup %1835 }
 0x2d7   :  { %v1573_v31 = vpack.c.bf16 %v1836_v30, %v1836_v30 }
 0x2d9   :  { %1395 = vst [vmem:[#allocation11 + $0x18] sm:$0xf] %v1573_v31 }
 0x2e2   :  { %v1309_v36 = vpop.f32.mrf.mxu0 }
 0x2e3   :  { %v1310_v37 = vadd.f32 %v1309_v36, %v601_v34 }
 0x2e4   :  { %v1311_v38 = vpop.f32.mrf.mxu0 }
 0x2e5   :  { %v1312_v39 = vadd.f32 %v1311_v38, %v605_v35  ;;  %1837 = vtanh.f32 %v1310_v37 }
 0x2e6   :  { %v1313_v40 = vpop.f32.mrf.mxu0 }
 0x2e7   :  { %1839 = vtanh.f32 %v1312_v39 }
 0x2e8   :  { %v1314_v41 = vpop.f32.mrf.mxu0 }
 0x2f2   :  { %v1838_v42 = vpop.eup %1837 }
 0x2f4   :  { %v1840_v43 = vpop.eup %1839 }
 0x2f5   :  { %v1572_v44 = vpack.c.bf16 %v1840_v43, %v1838_v42 }
 0x2f7   :  { %1394 = vst [vmem:[#allocation11 + $0x10] sm:$0xff] %v1572_v44 }
 0x2f8   :  { %1952 = shalt.err (!%p1949_p1)
}
 0x2f9   :  { %1405 = dma.vmem_to_hbm [thread:$0]  %s1403_s28, 448, %s2082_s7, [#allocation4]  }
 0x2fa   :  { %1967 = dma.done.wait [#allocation4], 448  }
 0x2fb   :  { %1968 = vsyncadd [#allocation4], 4294966848 }
 0x2fc   :  { %1409 = vsyncpa [#allocation3], 1 }
 0x2fd   :  { %1410 = vsyncpa [#allocation6], 1 }
 0x2fe   :  { %1411 = vsyncpa [#allocation9], 1 }
 0x2ff   :  { %1412 = vsyncpa [#allocation4], 1 }

</bundles_post_ra>
